<compile_context>
chip_gen: v5e
topology: v5e:2x2
jax: 0.10.0
libtpu: 0.0.40
codegen_flags: <defaults>
</compile_context>

<pallas_src>
import numpy as np

import jax
import jax.numpy as jnp
from jax.experimental import pallas as pl
from jax.experimental.pallas import tpu as pltpu


# -----------------------------------------------------------------------------
# Hardware-derived sizing
# -----------------------------------------------------------------------------
def _hw_params():
    """Returns (vmem_limit_bytes, target_tile_bytes) for the local TPU generation."""
    vmem_cap = 128 * 1024 * 1024
    try:  # trace-time hardware query; fall back to v5e/v6e defaults if unavailable
        vmem_cap = int(pltpu.get_tpu_info().vmem_capacity_bytes)
    except Exception:
        pass
    if vmem_cap <= 64 * 1024 * 1024:
        # v7x-class (64 MiB VMEM): leave the compiler headroom, keep tiles ~2 MiB.
        return 48 * 1024 * 1024, 2 * 1024 * 1024
    # v5e / v6e (128 MiB VMEM): larger tiles amortize per-step overhead for free.
    return 64 * 1024 * 1024, 4 * 1024 * 1024


def _pick_batch_chunk(n, bytes_per_image, target_bytes):
    """Largest divisor of n whose (chunk, H, W) tile stays under ~target_bytes."""
    cap = max(1, int(target_bytes) // max(int(bytes_per_image), 1))
    if n <= cap:
        return n
    best = 1
    for d in range(1, min(n, cap) + 1):
        if n % d == 0:
            best = d
    return best


def _same_block_matrix(size, block):
    """Symmetric 0/1 matrix S[i, j] = 1 iff i and j fall in the same pooling block.

    Built on the UNPADDED extent, so ceil_mode partial trailing blocks are simply
    smaller membership sets (sign of the block sum == sign of the ceil-mode avg).
    """
    grp = np.arange(size) // int(block)
    return (grp[:, None] == grp[None, :]).astype(np.float32)


# -----------------------------------------------------------------------------
# Kernel
# -----------------------------------------------------------------------------
def _block_relu_kernel(mode_ref, gid_ref, x_ref, sh_ref, sw_ref, o_ref):
    # x_ref: (BN, H, W) slab of one channel; sh_ref: (H, H); sw_ref: (W, W).
    c = pl.program_id(0)
    x = x_ref[...].astype(jnp.float32)
    bn, h, w = x.shape

    # Per-pixel block sums via two small batched MXU matmuls (separable pooling),
    # same contraction pattern as the documented flash-attention 'bqk,bkd->bqd':
    #   rows[n, i, w] = sum_h Sh[i, h] * x[n, h, w]      (pool + broadcast along H)
    #   bsum[n, h, v] = sum_w rows[n, h, w] * Sw[w, v]   (pool + broadcast along W)
    sh = jnp.broadcast_to(sh_ref[...], (bn, h, h))
    sw = jnp.broadcast_to(sw_ref[...], (bn, w, w))
    rows = jnp.einsum('nih,nhw->niw', sh, x, preferred_element_type=jnp.float32)
    bsum = jnp.einsum('nhw,nwv->nhv', rows, sw, preferred_element_type=jnp.float32)

    # (sign(bsum)+1)/2, fused with the per-channel mode and the multiply by x so the
    # relu map never touches HBM.
    mask = jnp.where(bsum > 0.0, 1.0, jnp.where(bsum < 0.0, 0.0, 0.5))
    mode = mode_ref[c]                      # 0: zero, 1: identity, 2: relu / block
    alpha = jnp.where(mode == 1, 1.0, 0.0)
    beta = jnp.where(mode == 2, 1.0, 0.0)
    o_ref[...] = (x * (alpha + beta * mask)).astype(o_ref.dtype)


# -----------------------------------------------------------------------------
# BlockRelu forward
# -----------------------------------------------------------------------------
def block_relu(activation, block_sizes):
    """activation: (N, C, H, W); block_sizes: (C, 2) ints. Returns relu_map * activation."""
    n, c, h, w = activation.shape
    bs = np.asarray(block_sizes, dtype=np.int64)
    assert bs.shape == (c, 2), "block_sizes must hold one (bh, bw) pair per channel"

    # ---- trace-time per-channel metadata (mirrors the PyTorch unique-block loop) ----
    mode = np.full((c,), 2, dtype=np.int32)     # 0: zero, 1: identity, 2: relu / block
    gid = np.zeros((c,), dtype=np.int32)        # index into the stacked Sh/Sw matrices
    group_keys = []
    for ch in range(c):
        bh, bw = int(bs[ch, 0]), int(bs[ch, 1])
        if (bh, bw) == (1, 0):
            mode[ch] = 0
        elif (bh, bw) == (0, 1):
            mode[ch] = 1
        else:                                   # (1,1) relu and all pooled block sizes
            if (bh, bw) not in group_keys:
                group_keys.append((bh, bw))
            gid[ch] = group_keys.index((bh, bw))
    if not group_keys:                          # all channels identity/zero: dummy group
        group_keys.append((1, 1))

    sh_all = np.stack([_same_block_matrix(h, bh) for bh, _ in group_keys])  # (G, H, H)
    sw_all = np.stack([_same_block_matrix(w, bw) for _, bw in group_keys])  # (G, W, W)

    vmem_limit, target_tile = _hw_params()
    bn = _pick_batch_chunk(n, h * w * activation.dtype.itemsize, target_tile)

    # Channel axis outermost (slow) so the per-channel Sh/Sw blocks stay resident
    # across the inner batch-chunk steps; both axes are independent -> 'parallel'.
    grid = (c, n // bn)
    kernel = pl.pallas_call(
        _block_relu_kernel,
        out_shape=jax.ShapeDtypeStruct((n, c, h, w), activation.dtype),
        grid_spec=pltpu.PrefetchScalarGridSpec(
            num_scalar_prefetch=2,              # mode, gid -> SMEM, drive the index_maps
            grid=grid,
            in_specs=[
                # Activation slab: (BN, 1, H, W) window, channel dim squeezed in-kernel.
                # Direct indexing of the original tensor: no gather / concat / inv-perm.
                pl.BlockSpec((bn, None, h, w),
                             lambda ci, nb, mode_r, gid_r: (nb, ci, 0, 0)),
                # Per-group pooling matrices selected by the prefetched group id; the
                # block index is constant over the inner batch axis (fetched once).
                pl.BlockSpec((None, h, h),
                             lambda ci, nb, mode_r, gid_r: (gid_r[ci], 0, 0)),
                pl.BlockSpec((None, w, w),
                             lambda ci, nb, mode_r, gid_r: (gid_r[ci], 0, 0)),
            ],
            out_specs=pl.BlockSpec((bn, None, h, w),
                                   lambda ci, nb, mode_r, gid_r: (nb, ci, 0, 0)),
        ),
        compiler_params=pltpu.CompilerParams(
            dimension_semantics=("parallel", "parallel"),
            vmem_limit_bytes=vmem_limit,
        ),
    )
    return kernel(jnp.asarray(mode), jnp.asarray(gid), activation,
                  jnp.asarray(sh_all), jnp.asarray(sw_all))


class BlockRelu:
    """JAX/Pallas port of research/bReLU.py::BlockRelu (forward only)."""

    def __init__(self, block_sizes):
        self.block_sizes = np.array(block_sizes)

    def __call__(self, activation):
        return block_relu(activation, self.block_sizes)


# -----------------------------------------------------------------------------
# Pure-JAX reference (mirrors the PyTorch module)
# -----------------------------------------------------------------------------
def _reference(x, block_sizes):
    n, c, h, w = x.shape
    bs = np.asarray(block_sizes)
    maps = []
    for ch in range(c):
        bh, bw = int(bs[ch, 0]), int(bs[ch, 1])
        xc = x[:, ch]
        if (bh, bw) == (1, 1):
            m = (jnp.sign(xc) + 1.0) / 2.0
        elif (bh, bw) == (0, 1):
            m = jnp.ones_like(xc)
        elif (bh, bw) == (1, 0):
            m = jnp.zeros_like(xc)
        else:
            hp = ((h + bh - 1) // bh) * bh
            wp = ((w + bw - 1) // bw) * bw
            xp = jnp.pad(xc, ((0, 0), (0, hp - h), (0, wp - w)))
            pooled = xp.reshape(n, hp // bh, bh, wp // bw, bw).mean(axis=(2, 4))
            m = (jnp.sign(pooled) + 1.0) / 2.0
            m = jnp.repeat(jnp.repeat(m, bh, axis=1), bw, axis=2)[:, :h, :w]
        maps.append(m)
    relu_map = jnp.stack(maps, axis=1)
    return relu_map * x


if __name__ == "__main__":
    key = jax.random.PRNGKey(0)
    n, c, h, w = 2, 6, 16, 16
    # one of each special case + a multi-channel block group + a ceil-mode (non-dividing) block
    block_sizes = [[1, 1], [0, 1], [1, 0], [2, 2], [2, 2], [3, 2]]
    x = jax.random.normal(key, (n, c, h, w), dtype=jnp.float32)

    module = BlockRelu(block_sizes)
    out = jax.block_until_ready(module(x))

    ref = _reference(x, block_sizes)
    assert out.shape == (n, c, h, w)
    assert jnp.allclose(out, ref, atol=1e-5, rtol=1e-5), "Pallas BlockRelu mismatch vs reference"

    print("KERNEL_OK")
</pallas_src>

<mosaic_0001>
module attributes {stable_mosaic.version = 11 : i64} {
  func.func @_block_relu_kernel(%arg0: i32, %arg1: i32, %arg2: memref<6xi32, #tpu.memory_space<smem>>, %arg3: memref<6xi32, #tpu.memory_space<smem>>, %arg4: memref<2x1x16x16xf32, #tpu.memory_space<vmem>>, %arg5: memref<1x16x16xf32, #tpu.memory_space<vmem>>, %arg6: memref<1x16x16xf32, #tpu.memory_space<vmem>>, %arg7: memref<2x1x16x16xf32, #tpu.memory_space<vmem>>) attributes {dimension_semantics = [#tpu.dimension_semantics<parallel>, #tpu.dimension_semantics<parallel>], iteration_bounds = array<i64: 6, 1>, scalar_prefetch = 2 : i64, scratch_operands = 0 : i64, tpu.core_type = #tpu.core_type<tc>, window_params = [{transform_indices = @transform_0, window_bounds = array<i64: 2, 1, 16, 16>}, {transform_indices = @transform_1, window_bounds = array<i64: 1, 16, 16>}, {transform_indices = @transform_2, window_bounds = array<i64: 1, 16, 16>}, {transform_indices = @transform_3, window_bounds = array<i64: 2, 1, 16, 16>}]} {
    %c0 = arith.constant 0 : index
    %c0_0 = arith.constant 0 : index
    %c0_1 = arith.constant 0 : index
    %c0_2 = arith.constant 0 : index
    %0 = vector.load %arg4[%c0, %c0_0, %c0_1, %c0_2] : memref<2x1x16x16xf32, #tpu.memory_space<vmem>>, vector<2x1x16x16xf32>
    %1 = vector.shape_cast %0 : vector<2x1x16x16xf32> to vector<2x16x16xf32>
    %c0_3 = arith.constant 0 : index
    %c0_4 = arith.constant 0 : index
    %c0_5 = arith.constant 0 : index
    %2 = vector.load %arg5[%c0_3, %c0_4, %c0_5] : memref<1x16x16xf32, #tpu.memory_space<vmem>>, vector<1x16x16xf32>
    %3 = vector.shape_cast %2 : vector<1x16x16xf32> to vector<16x16xf32>
    %4 = vector.shape_cast %3 : vector<16x16xf32> to vector<1x16x16xf32>
    %5 = vector.broadcast %4 : vector<1x16x16xf32> to vector<2x16x16xf32>
    %c0_6 = arith.constant 0 : index
    %c0_7 = arith.constant 0 : index
    %c0_8 = arith.constant 0 : index
    %6 = vector.load %arg6[%c0_6, %c0_7, %c0_8] : memref<1x16x16xf32, #tpu.memory_space<vmem>>, vector<1x16x16xf32>
    %7 = vector.shape_cast %6 : vector<1x16x16xf32> to vector<16x16xf32>
    %8 = vector.shape_cast %7 : vector<16x16xf32> to vector<1x16x16xf32>
    %9 = vector.broadcast %8 : vector<1x16x16xf32> to vector<2x16x16xf32>
    "tpu.trace_start"() <{level = 10 : i32, message = "nih,nhw->niw"}> : () -> ()
    %cst = arith.constant dense<0.000000e+00> : vector<2x16x16xf32>
    %10 = tpu.matmul %5, %1, %cst {dimension_numbers = #tpu.dot_dimension_numbers<[2], [1], [1], [2], [0, 0, 0, 1, 1, 2], [0], [0]>} : vector<2x16x16xf32>, vector<2x16x16xf32>, vector<2x16x16xf32> -> vector<2x16x16xf32>
    "tpu.trace_stop"() : () -> ()
    "tpu.trace_start"() <{level = 10 : i32, message = "nhw,nwv->nhv"}> : () -> ()
    %cst_9 = arith.constant dense<0.000000e+00> : vector<2x16x16xf32>
    %11 = tpu.matmul %10, %9, %cst_9 {dimension_numbers = #tpu.dot_dimension_numbers<[2], [1], [1], [2], [0, 0, 0, 1, 1, 2], [0], [0]>} : vector<2x16x16xf32>, vector<2x16x16xf32>, vector<2x16x16xf32> -> vector<2x16x16xf32>
    %cst_10 = arith.constant 0.000000e+00 : f32
    "tpu.trace_stop"() : () -> ()
    %12 = vector.broadcast %cst_10 : f32 to vector<2x16x16xf32>
    %13 = arith.cmpf ogt, %11, %12 : vector<2x16x16xf32>
    %cst_11 = arith.constant 0.000000e+00 : f32
    %14 = vector.broadcast %cst_11 : f32 to vector<2x16x16xf32>
    %15 = arith.cmpf olt, %11, %14 : vector<2x16x16xf32>
    %cst_12 = arith.constant 0.000000e+00 : f32
    %cst_13 = arith.constant 5.000000e-01 : f32
    %16 = vector.broadcast %cst_12 : f32 to vector<2x16x16xf32>
    %17 = vector.broadcast %cst_13 : f32 to vector<2x16x16xf32>
    %18 = arith.select %15, %16, %17 : vector<2x16x16xi1>, vector<2x16x16xf32>
    %cst_14 = arith.constant 1.000000e+00 : f32
    %19 = vector.broadcast %cst_14 : f32 to vector<2x16x16xf32>
    %20 = arith.select %13, %19, %18 : vector<2x16x16xi1>, vector<2x16x16xf32>
    %21 = arith.index_cast %arg0 : i32 to index
    %22 = memref.load %arg2[%21] : memref<6xi32, #tpu.memory_space<smem>>
    %c1_i32 = arith.constant 1 : i32
    %23 = arith.cmpi eq, %22, %c1_i32 : i32
    %cst_15 = arith.constant 1.000000e+00 : f32
    %cst_16 = arith.constant 0.000000e+00 : f32
    %24 = arith.select %23, %cst_15, %cst_16 : f32
    %c2_i32 = arith.constant 2 : i32
    %25 = arith.cmpi eq, %22, %c2_i32 : i32
    %cst_17 = arith.constant 1.000000e+00 : f32
    %cst_18 = arith.constant 0.000000e+00 : f32
    %26 = arith.select %25, %cst_17, %cst_18 : f32
    %27 = vector.broadcast %26 : f32 to vector<2x16x16xf32>
    %28 = arith.mulf %27, %20 : vector<2x16x16xf32>
    %29 = vector.broadcast %24 : f32 to vector<2x16x16xf32>
    %30 = arith.addf %29, %28 : vector<2x16x16xf32>
    %31 = arith.mulf %1, %30 : vector<2x16x16xf32>
    %c0_19 = arith.constant 0 : index
    %c0_20 = arith.constant 0 : index
    %c0_21 = arith.constant 0 : index
    %c0_22 = arith.constant 0 : index
    %32 = vector.load %arg7[%c0_19, %c0_20, %c0_21, %c0_22] : memref<2x1x16x16xf32, #tpu.memory_space<vmem>>, vector<2x1x16x16xf32>
    %33 = vector.shape_cast %32 : vector<2x1x16x16xf32> to vector<2x16x16xf32>
    %34 = vector.shape_cast %31 : vector<2x16x16xf32> to vector<2x1x16x16xf32>
    tpu.vector_store %arg7[%c0_19, %c0_20, %c0_21, %c0_22], %34 {strides = array<i32>} : memref<2x1x16x16xf32, #tpu.memory_space<vmem>>, vector<2x1x16x16xf32>,
    return
  }
  func.func @transform_0(%arg0: i32, %arg1: i32, %arg2: memref<6xi32, #tpu.memory_space<smem>>, %arg3: memref<6xi32, #tpu.memory_space<smem>>) -> (i32, i32, i32, i32) {
    %c0_i32 = arith.constant 0 : i32
    %c0_i32_0 = arith.constant 0 : i32
    %c0_i32_1 = arith.constant 0 : i32
    return %arg1, %arg0, %c0_i32, %c0_i32_0 : i32, i32, i32, i32
  }
  func.func @transform_1(%arg0: i32, %arg1: i32, %arg2: memref<6xi32, #tpu.memory_space<smem>>, %arg3: memref<6xi32, #tpu.memory_space<smem>>) -> (i32, i32, i32) {
    %0 = arith.index_cast %arg0 : i32 to index
    %1 = memref.load %arg3[%0] : memref<6xi32, #tpu.memory_space<smem>>
    %c0_i32 = arith.constant 0 : i32
    %c0_i32_0 = arith.constant 0 : i32
    %c0_i32_1 = arith.constant 0 : i32
    return %1, %c0_i32, %c0_i32_0 : i32, i32, i32
  }
  func.func @transform_2(%arg0: i32, %arg1: i32, %arg2: memref<6xi32, #tpu.memory_space<smem>>, %arg3: memref<6xi32, #tpu.memory_space<smem>>) -> (i32, i32, i32) {
    %0 = arith.index_cast %arg0 : i32 to index
    %1 = memref.load %arg3[%0] : memref<6xi32, #tpu.memory_space<smem>>
    %c0_i32 = arith.constant 0 : i32
    %c0_i32_0 = arith.constant 0 : i32
    %c0_i32_1 = arith.constant 0 : i32
    return %1, %c0_i32, %c0_i32_0 : i32, i32, i32
  }
  func.func @transform_3(%arg0: i32, %arg1: i32, %arg2: memref<6xi32, #tpu.memory_space<smem>>, %arg3: memref<6xi32, #tpu.memory_space<smem>>) -> (i32, i32, i32, i32) {
    %c0_i32 = arith.constant 0 : i32
    %c0_i32_0 = arith.constant 0 : i32
    %c0_i32_1 = arith.constant 0 : i32
    return %arg1, %arg0, %c0_i32, %c0_i32_0 : i32, i32, i32, i32
  }
}

</mosaic_0001>

<bundles_post_ra>
// kernel: tpu_custom_call.1
= control target key start
LH: loop header
LB: loop body
LE: loop exit
PB: predicated region body
PF: predicated region fallthrough
CT: control target
= control target key end

     0   :  { %s1046_s24 = smov [#allocation3]   ;;  %s1047_s25 = smov [#allocation4]   ;;  %s1433_s0 = inlined_call_operand.hbm [shape: s32[6], index: 0, kind: input, shape index: {}]   ;;  %s1434_s2 = inlined_call_operand.hbm [shape: f32[2,6,16,16], index: 2, kind: input, shape index: {}]   ;;  %s1435_s3 = inlined_call_operand.hbm [shape: f32[3,16,16], index: 3, kind: input, shape index: {}]   ;;  %s1436_s4 = inlined_call_operand.hbm [shape: f32[3,16,16], index: 4, kind: input, shape index: {}]   ;;  %s1437_s5 = inlined_call_operand.hbm [shape: f32[2,6,16,16], index: 5, kind: output, shape index: {}]   ;;  %s1438_s1 = inlined_call_operand.hbm [shape: s32[6], index: 1, kind: input, shape index: {}]  }
   0x1   :  { %1452 = sst [smem:[#allocation36_spill]] %s1434_s2  ;;  %s11_s20 = sshll.u32 %s1433_s0, 4  ;;  %s12_s20 = int_to_ptr.hbm [resolvable:$true] %s11_s20 }
   0x2   :  { %1453 = sst [smem:[#allocation37_spill]] %s1437_s5  ;;  %s16_s23 = sshll.u32 %s1438_s1, 4  ;;  %s17_s23 = int_to_ptr.hbm [resolvable:$true] %s16_s23 }
   0x3   :  { %14 = dma.hbm_to_smem %s12_s20, 16, %s1046_s24, [#allocation2] }
   0x4   :  { %19 = dma.hbm_to_smem %s17_s23, 16, %s1047_s25, [#allocation2] }
   0x5   :  { %980 = dma.done.wait [#allocation2], 32 }
   0x6   :  { %981 = vsyncadd [#allocation2], 4294967264 }
   0x7   :  { %22 = sfence }
   0x8   :  { %23 = vsyncpa [#allocation6], 0 }
   0x9   :  { %25 = vsyncpa [#allocation6 + $0x1], 0 }
   0xa   :  { %26 = vsyncpa [#allocation9], 0 }
   0xb   :  { %28 = vsyncpa [#allocation9 + $0x1], 0 }
   0xc   :  { %29 = vsyncpa [#allocation7], 0 }
   0xd   :  { %31 = vsyncpa [#allocation7 + $0x1], 0  ;;  %s1100_s0 = smov 0   ;;  %s1102_s26 = smov 0  }
   0xe   :  { %s1104_s1 = smov 0   ;;  %s1106_s27 = smov 0  }
   0xf   :  { %s1108_s28 = smov 0   ;;  %s1110_s29 = smov 0  }
  0x10   :  { %s1112_s30 = smov 0   ;;  %s1114_s6 = smov 0  }
  0x11   :  { %s1116_s7 = smov 0   ;;  %s1118_s8 = smov 0  }
  0x12   :  { %s1120_s9 = smov 0   ;;  %s1122_s10 = smov 0  }
  0x13 LB: > { %1454 = sst [smem:[#allocation24_spill]] %s1008_s1  ;;  %s1161_s11 = sadd.s32 4294967295, %s1044_s10   ;;  %s1044_s10 = sphi %s1122_s10, %s37_s10   ;;  %s1040_s9 = sphi %s1120_s9, %s1490_s9   ;;  %s1036_s8 = sphi %s1118_s8, %s1489_s8   ;;  %s1032_s7 = sphi %s1116_s7, %s1488_s7   ;;  %s1028_s6 = sphi %s1114_s6, %s1496_s6   ;;  %s1024_s30 = sphi %s1112_s30, %s1495_s30   ;;  %s1020_s29 = sphi %s1110_s29, %s1486_s29   ;;  %s1016_s28 = sphi %s1108_s28, %s1494_s28   ;;  %s1012_s27 = sphi %s1106_s27, %s1493_s27   ;;  %s1008_s1 = sphi %s1104_s1, %s1484_s1   ;;  %s1004_s26 = sphi %s1102_s26, %s1492_s26   ;;  %s1000_s0 = sphi %s1100_s0, %s1491_s0  }
  0x14   : > { %1455 = sst [smem:[#allocation25_spill]] %s1020_s29  ;;  %s49_s12 = sadd.s32 1, %s1040_s9 }
  0x15   : > { %1456 = sst [smem:[#allocation26_spill]] %s1024_s30  ;;  %s58_s13 = sadd.s32 1, %s1032_s7 }
  0x16   : > { %1457 = sst [smem:[#allocation27_spill]] %s1032_s7  ;;  %p51_p0 = scmp.ge.s32.totalorder %s49_s12, 6 }
  0x17   : > { %1458 = sst [smem:[#allocation28_spill]] %s1036_s8  ;;  %p65_p1 = scmp.ne.s32.totalorder %s1032_s7, %s1028_s6 }
  0x18   : > { %1459 = sst [smem:[#allocation29_spill]] %s1040_s9  ;;  %p66_p2 = scmp.eq.s32.totalorder %s1044_s10, 0 }
  0x19   : > { %p1439_p3 = scmp.ne.s32.totalorder %s1028_s6, %s1024_s30  ;;  %s1498_s12 = smov (%p51_p0, %s49_s12), 0 }
  0x1a   : > { %1460 = sst [smem:[#allocation30_spill]] %s1498_s12  ;;  %p1177_p4 = por %p66_p2, %p65_p1 }
  0x1b   : > { %p72_p5 = scmp.eq.s32.totalorder %s1161_s11, 0  ;;  %s54_s15 = ssub.s32 %s1040_s9, %s1498_s12 }
  0x1c   : > { %s81_s16 = sld [smem:[#allocation4 + %s1040_s9]]  ;;  %p56_p6 = scmp.eq.s32.totalorder %s54_s15, 0 }
  0x1d   : > { %p1190_p7 = por %p72_p5, %p1439_p3  ;;  %s672_s18 = sadd.s32 4294967294, %s1044_s10  }
  0x1e   : > { %s82_s19 = sld [smem:[#allocation4 + %s1498_s12]]  ;;  %p93_p8 = scmp.ne.s32.totalorder %s1020_s29, %s1016_s28 }
  0x1f   : > { %s1462_s17 = scalar_select %p1190_p7, 1, 0 }
  0x20   : > { %s1197_s20 = scalar_select %p56_p6, %s1032_s7, %s58_s13  }
  0x21   : > { %p99_p9 = scmp.ne.s32.totalorder %s1016_s28, %s1012_s27  ;;  %s86_s21 = sadd.s32 1, %s1020_s29 }
  0x22   : > { %1463 = sst [smem:[#allocation31_spill]] %s1197_s20  ;;  %p1207_p10 = por %p93_p8, %p66_p2 }
  0x23   : > { %s109_s22 = sld [smem:[#allocation4 + %s1040_s9]]  ;;  %p1213_p11 = por %p99_p9, %p72_p5 }
  0x24   : > { %s110_s25 = sld [smem:[#allocation4 + %s1498_s12]]  ;;  %p121_p12 = scmp.ne.s32.totalorder %s1008_s1, %s1004_s26 }
  0x25   : > { %s1465_s24 = scalar_select %p1213_p11, 1, 0 }
  0x26   : > { %s83_s13 = ssub.s32 %s81_s16, %s82_s19  ;;  %p127_p13 = scmp.ne.s32.totalorder %s1004_s26, %s1000_s0 }
  0x27   : > { %p84_p0 = scmp.eq.s32.totalorder %s83_s13, 0  ;;  %p1224_p6 = por %p121_p12, %p66_p2 }
  0x28   : > { %p1230_p8 = por %p127_p13, %p72_p5  ;;  %p153_p9 = scmp.eq.s32.totalorder %s1161_s11, 5 }
  0x29   : > { %s1236_s20 = scalar_select %p84_p0, %s1020_s29, %s86_s21  }
  0x2a   : > { %p1241_p3 = por %p153_p9, %p65_p1  ;;  %p159_p11 = scmp.eq.s32.totalorder %s672_s18, 5 }
  0x2b   : > { %1468 = sst [smem:[#allocation32_spill]] %s1236_s20  ;;  %s111_s0 = ssub.s32 %s109_s22, %s110_s25 }
  0x2c   : > { %s1469_s12 = scalar_select %p1241_p3, 1, 0 }
  0x2d   : > { %s114_s16 = sadd.s32 1, %s1008_s1  ;;  %p112_p2 = scmp.eq.s32.totalorder %s111_s0, 0 }
  0x2e   : > { %1470 = sst [smem:[#allocation33_spill]] %s1469_s12  ;;  %p1471_p12 = scmp.ne.s32.totalorder %s1028_s6, %s1024_s30 }
  0x2f   : > { %s1254_s13 = scalar_select %p112_p2, %s1008_s1, %s114_s16  }
  0x30   : > { %p1249_p7 = por %p159_p11, %p1471_p12  ;;  %p674_p5 = scmp.ge.s32.totalorder %s1044_s10, 6 }
  0x31   : > { %1474 = sst [smem:[#allocation35_spill]] %s1254_s13 }
  0x32   : > { %s1472_s19 = scalar_select %p1249_p7, 1, 0 }
  0x33   : > { %175 = sbr.rel (%p674_p5) target bundleno = 112 (0x70), region = 16 }
  0x34   : > { %1473 = sst [smem:[#allocation34_spill]] %s1472_s19 }
  0x38   : > { %s179_s21 = sand.u32 1, %s1032_s7   ;;  %s704_s18 = sshll.u32 %s1040_s9, 4 }
  0x39   : > { %s675_s22 = sshll.u32 %s179_s21, 5  ;;  %s1475_s2 = sld [smem:[#allocation36_spill]] }
  0x3a   : > { %s708_s16 = scalar_select %p1177_p4, [#allocation0], [#allocation16] }
  0x3b   : > { %s183_s19 = scalar_lea.vmem [#allocation5], %s675_s22  ;;  %s1048_s7 = smov 1536  }
  0x3c   : > { %s206_s30 = sshll.u32 %s183_s19, 4  ;;  %s196_s5 = sld [smem:[%s708_s16]]   ;;  %s207_s30 = int_to_ptr.vmem [resolvable:$true] %s206_s30 }
  0x3d   : > { %709 = sst [smem:[#allocation13]] (%p1177_p4), %s1048_s7  ;;  %s1049_s12 = smov 256  }
  0x3e   : > { %710 = sst [smem:[#allocation13 + $0x1]] (%p1177_p4), %s1049_s12  ;;  %s1050_s25 = smov 2  }
  0x3f   : > { %s191_s20 = scalar_lea.hbm %s1475_s2, %s704_s18  ;;  %711 = sst [smem:[#allocation13 + $0x2]] (%p1177_p4), %s1050_s25 }
  0x40   : > { %s204_s13 = sshll.u32 %s191_s20, 4  ;;  %s1051_s18 = smov 128   ;;  %s205_s13 = int_to_ptr.hbm [resolvable:$true] %s204_s13 }
  0x41   : > { %712 = sst [smem:[#allocation13 + $0x3]] (%p1177_p4), %s1051_s18  ;;  %s1052_s22 = smov 8  }
  0x42   : > { %s678_s20 = sshll.u32 %s196_s5, 26  ;;  %713 = sst [smem:[#allocation13 + $0x4]] (%p1177_p4), %s1051_s18 }
  0x43   : > { %s679_s19 = sadd.s32 134217728, %s678_s20  ;;  %714 = sst [smem:[#allocation13 + $0x5]] (%p1177_p4), %s1052_s22 }
  0x44   : > { %s180_s0 = scalar_lea.sflag [#allocation6], %s179_s21  ;;  %s1053_s16 = smov [#allocation12]  }
  0x45   : > { %715 = dma.general (%p1177_p4), %s205_s13, 512, %s207_s30, %s180_s0, %s1053_s16, [#allocation13], %s679_s19, 0  }
  0x46   : > { %s231_s5 = sand.u32 1, %s1020_s29   ;;  %s229_s7 = sand.u32 1, %s1044_s10  }
  0x47   : > { %s680_s12 = sshll.u32 %s231_s5, 4  ;;  %s254_s20 = sand.u32 1, %s1008_s1  }
  0x48   : > { %s716_s25 = scalar_select %p1207_p10, [#allocation4], [#allocation17] }
  0x49   : > { %s717_s18 = scalar_select %p1207_p10, %s1040_s9, 0 }
  0x4a   : > { %s233_s14 = scalar_lea.vmem [#allocation8], %s680_s12  ;;  %s1288_s13 = sshll.u32 %s254_s20, 4 }
  0x4b   : > { %s234_s21 = sld [smem:[%s716_s25 + %s717_s18]]  ;;  %s1286_s30 = sshll.u32 %s233_s14, 4  ;;  %s243_s30 = int_to_ptr.vmem [resolvable:$true] %s1286_s30 }
  0x4c   : > { %s719_s19 = scalar_select %p1224_p6, [#allocation4], [#allocation18] }
  0x4d   : > { %s720_s22 = scalar_select %p1224_p6, %s1040_s9, 0 }
  0x4e   : > { %s1299_s12 = scalar_lea.sflag [#allocation9], %s229_s7 }
  0x4f   : > { %s257_s29 = sld [smem:[%s719_s19 + %s720_s22]] }
  0x51   : > { %s705_s0 = sshll.u32 %s234_s21, 4  ;;  %s882_s21 = scalar_lea.hbm %s1435_s3, 48 }
  0x52   : > { %s239_s2 = scalar_lea.hbm %s1435_s3, %s705_s0 }
  0x53   : > { %s240_s25 = sshll.u32 %s239_s2, 4  ;;  %s241_s25 = int_to_ptr.hbm [resolvable:$true] %s240_s25 }
  0x54   : > { %s876_s18 = sshra.s32 %s241_s25, 4  ;;  %s877_s18 = int_to_ptr.hbm [resolvable:$true] %s876_s18 }
  0x55   : > { %s878_s14 = scalar_lea.hbm %s877_s18, 16  ;;  %p883_p13 = scmp.lt.s32.totalorder %s877_s18, %s1435_s3 }
  0x56   : > { %p879_p1 = scmp.ne.s32.totalorder %s877_s18, %s878_s14  ;;  %p884_p0 = scmp.lt.s32.totalorder %s882_s21, %s878_s14 }
  0x58   : > { %p880_p4 = pnand %p879_p1, %p1207_p10  ;;  %p885_p9 = por %p884_p0, %p883_p13 }
  0x5a   : > { %p881_p11 = pneg %p880_p4 }
  0x5c   : > { %p886_p2 = pnand %p885_p9, %p881_p11 }
  0x5e   : > { %889 = shalt.err (!%p886_p2)
}
  0x5f   : > { %s1054_s2 = smov 128   ;;  %s1055_s7 = smov 8  }
  0x60   : > { %718 = dma.hbm_to_vmem [thread:$0]  (%p1207_p10), %s241_s25, 256, %s243_s30, %s1299_s12, %s1054_s2, %s1054_s2, %s1055_s7  }
  0x61   : > { %s256_s19 = scalar_lea.vmem [#allocation10], %s1288_s13  ;;  %s706_s9 = sshll.u32 %s257_s29, 4 }
  0x62   : > { %s265_s22 = sshll.u32 %s256_s19, 4  ;;  %s262_s1 = scalar_lea.hbm %s1436_s4, %s706_s9  ;;  %s266_s22 = int_to_ptr.vmem [resolvable:$true] %s265_s22 }
  0x63   : > { %s263_s8 = sshll.u32 %s262_s1, 4  ;;  %s910_s30 = scalar_lea.hbm %s1436_s4, 48  ;;  %s264_s8 = int_to_ptr.hbm [resolvable:$true] %s263_s8 }
  0x64   : > { %s904_s5 = sshra.s32 %s264_s8, 4  ;;  %s905_s5 = int_to_ptr.hbm [resolvable:$true] %s904_s5 }
  0x65   : > { %s906_s18 = scalar_lea.hbm %s905_s5, 16  ;;  %p911_p10 = scmp.lt.s32.totalorder %s905_s5, %s1436_s4 }
  0x66   : > { %p907_p12 = scmp.ne.s32.totalorder %s905_s5, %s906_s18  ;;  %p912_p4 = scmp.lt.s32.totalorder %s910_s30, %s906_s18 }
  0x68   : > { %p908_p5 = pnand %p907_p12, %p1224_p6  ;;  %p913_p11 = por %p912_p4, %p911_p10 }
  0x6a   : > { %p909_p1 = pneg %p908_p5 }
  0x6c   : > { %p914_p13 = pnand %p913_p11, %p909_p1 }
  0x6e   : > { %917 = shalt.err (!%p914_p13)
}
  0x6f   : > { %721 = dma.hbm_to_vmem [thread:$0]  (%p1224_p6), %s264_s8, 256, %s266_s22, %s1299_s12, %s1054_s2, %s1054_s2, %s1055_s7  }
  0x70 PF: > { %p686_p0 = scmp.ge.s32.totalorder %s1044_s10, 1  ;;  %p273_p9 = scmp.lt.s32.totalorder %s1044_s10, 7 }
  0x72   : > { %p274_p2 = pnand %p686_p0, %p273_p9 }
  0x73   : > { %s1330_s25 = sand.u32 (!%p274_p2), 1, %s1028_s6   ;;  %p1476_p12 = scmp.ne.s32.totalorder (!%p274_p2), %s1462_s17, 0 }
  0x74   : > { %277 = sbr.rel (%p274_p2) target bundleno = 422 (0x1a6), region = 32  ;;  %s687_s20 = sshll.u32 (!%p274_p2), %s1330_s25, 5 }
  0x75   : > { %s280_s21 = scalar_lea.sflag (!%p274_p2), [#allocation6], %s1330_s25  ;;  %s283_s27 = scalar_lea.vmem (!%p274_p2), [#allocation5], %s687_s20 }
  0x79   : > { %983 = dma.done.wait (%p1476_p12), %s280_s21, 512  }
  0x7a   : > { %985 = vsyncadd (%p1476_p12), %s280_s21, 4294966784  ;;  %s289_s12 = sand.u32 1, %s1161_s11   ;;  %s291_s2 = sand.u32 1, %s1016_s28  }
  0x7b   : > { %s688_s7 = sshll.u32 %s291_s2, 4  ;;  %s290_s19 = scalar_lea.sflag [#allocation9], %s289_s12 }
  0x7c   : > { %s293_s22 = scalar_lea.vmem [#allocation8], %s688_s7  ;;  %p1477_p6 = scmp.ne.s32.totalorder %s1465_s24, 0 }
  0x7e   : > { %987 = dma.done.wait (%p1477_p6), %s290_s19, 256  }
  0x7f   : > { %989 = vsyncadd (%p1477_p6), %s290_s19, 4294967040  ;;  %s301_s9 = sand.u32 1, %s1004_s26  }
  0x80   : > { %s689_s0 = sshll.u32 %s301_s9, 4 }
  0x81   : > { %s303_s16 = scalar_lea.vmem [#allocation10], %s689_s0 }
  0x82   : > { %991 = dma.done.wait (%p1230_p8), %s290_s19, 256  }
  0x83   : > { %993 = vsyncadd (%p1230_p8), %s290_s19, 4294967040  ;;  %v1351_v0 = vld [vmem:[%s283_s27 + $0x8] sm:$0xff]  ;;  %v1353_v1 = vld [vmem:[%s283_s27 + $0x18] sm:$0xff]  ;;  %vm349_vm0 = vcmask 130048   ;;  %s1478_s11 = sld [smem:[#allocation28_spill]]  ;;  %v1056_v15 = vmov 0.5  }
  0x84   : > { %v341_v2 = vld [vmem:[%s283_s27] sm:$0xff]  ;;  %370 = vmatpush.msra.mxu0 %v1351_v0  ;;  %393 = vmatpush.msra.mxu1 %v1353_v1  ;;  %v343_v3 = vld [vmem:[%s283_s27 + $0x10] sm:$0xff]  ;;  %v348_v5 = vld [vmem:[%s303_s16 + $0x8] sm:$0xff]  ;;  %s336_s1 = scalar_lea.vmem [#allocation11], %s687_s20  ;;  %s500_s8 = scalar_lea.sflag [#allocation7], %s1330_s25 }
  0x85   : > { %v345_v4 = vld [vmem:[%s293_s22] sm:$0xff]  ;;  %422 = vmatpush.msra.mxu2 %v348_v5  ;;  %451 = vmatpush.msra.mxu3 %v348_v5  ;;  %v346_v6 = vld [vmem:[%s293_s22 + $0x8] sm:$0xff] }
  0x86   : > { %371 = vmatpush.msra.mxu0 %v341_v2  ;;  %394 = vmatpush.msra.mxu1 %v343_v3  ;;  %v347_v7 = vld [vmem:[%s303_s16] sm:$0xff] }
  0x87   : > { %691 = vmatmul.msk.f32.vlgmr.msra.gmra.mxu0 %vm349_vm0, %v345_v4  ;;  %693 = vmatmul.msk.f32.vlgmr.msra.gmra.mxu1 %vm349_vm0, %v345_v4 }
  0x88   : > { %423 = vmatpush.msra.mxu2 %v347_v7  ;;  %452 = vmatpush.msra.mxu3 %v347_v7 }
  0x89   : > { %s476_s17 = sld [smem:[#allocation3 + %s1478_s11]] }
  0x8f   : > { %692 = vmatmul.msk.f32.gmra.mxu0 %vm349_vm0, %v346_v6  ;;  %694 = vmatmul.msk.f32.gmra.mxu1 %vm349_vm0, %v346_v6  ;;  %p479_p8 = scmp.eq.s32.totalorder %s476_s17, 2  ;;  %p477_p5 = scmp.eq.s32.totalorder %s476_s17, 1 }
  0x91   : > { %s480_s24 = scalar_select %p479_p8, 1.0, 0.0 }
  0x92   : > { %s478_s15 = scalar_select %p477_p5, 1.0, 0.0 }
  0x93   : > { %v481_v13 = vstv %s480_s24 }
  0x94   : > { %v486_v19 = vstv %s478_s15 }
 0x104   : > { %v373_v8 = vpop.f32.mrf.mxu0  ;;  %v396_v9 = vpop.f32.mrf.mxu1 }
 0x105   : > { %695 = vmatmul.msk.f32.vlgmr.msra.gmra.mxu2 %vm349_vm0, %v373_v8  ;;  %697 = vmatmul.msk.f32.vlgmr.msra.gmra.mxu3 %vm349_vm0, %v396_v9 }
 0x10c   : > { %v376_v10 = vpop.f32.mrf.mxu0  ;;  %v399_v11 = vpop.f32.mrf.mxu1 }
 0x10d   : > { %696 = vmatmul.msk.f32.gmra.mxu2 %vm349_vm0, %v376_v10  ;;  %698 = vmatmul.msk.f32.gmra.mxu3 %vm349_vm0, %v399_v11 }
 0x188   : > { %v425_v12 = vpop.f32.mrf.mxu2  ;;  %v454_v14 = vpop.f32.mrf.mxu3 }
 0x189   : > { %vm460_vm1 = vcmp.gt.f32.partialorder %v425_v12, 0.0  ;;  %vm464_vm2 = vcmp.lt.f32.partialorder %v425_v12, 0.0  ;;  %vm462_vm3 = vcmp.gt.f32.partialorder %v454_v14, 0.0  ;;  %vm466_vm4 = vcmp.lt.f32.partialorder %v454_v14, 0.0 }
 0x18a   : > { %v468_v16 = vsel %vm464_vm2, 0.0, %v1056_v15  ;;  %v470_v17 = vsel %vm466_vm4, 0.0, %v1056_v15 }
 0x18b   : > { %v472_v18 = vsel %vm460_vm1, 1.0, %v468_v16  ;;  %v474_v20 = vsel %vm462_vm3, 1.0, %v470_v17 }
 0x18c   : > { %v482_v21 = vmul.f32 %v481_v13, %v472_v18  ;;  %v484_v22 = vmul.f32 %v481_v13, %v474_v20 }
 0x18e   : > { %v487_v23 = vadd.f32 %v486_v19, %v482_v21  ;;  %v489_v24 = vadd.f32 %v486_v19, %v484_v22 }
 0x190   : > { %v491_v25 = vmul.f32 %v487_v23, %v341_v2  ;;  %v493_v26 = vmul.f32 %v489_v24, %v343_v3  ;;  %v428_v27 = vpop.f32.mrf.mxu2  ;;  %v457_v28 = vpop.f32.mrf.mxu3 }
 0x191   : > { %vm461_vm5 = vcmp.gt.f32.partialorder %v428_v27, 0.0  ;;  %vm465_vm6 = vcmp.lt.f32.partialorder %v428_v27, 0.0  ;;  %vm463_vm7 = vcmp.gt.f32.partialorder %v457_v28, 0.0  ;;  %vm467_vm8 = vcmp.lt.f32.partialorder %v457_v28, 0.0 }
 0x192   : > { %495 = vst.msk [vmem:[%s336_s1] sm:$0xff] %vm349_vm0, %v491_v25  ;;  %v469_v29 = vsel %vm465_vm6, 0.0, %v1056_v15  ;;  %v471_v30 = vsel %vm467_vm8, 0.0, %v1056_v15 }
 0x193   : > { %497 = vst.msk [vmem:[%s336_s1 + $0x10] sm:$0xff] %vm349_vm0, %v493_v26  ;;  %v473_v31 = vsel %vm461_vm5, 1.0, %v469_v29  ;;  %v475_v32 = vsel %vm463_vm7, 1.0, %v471_v30 }
 0x194   : > { %v483_v33 = vmul.f32 %v481_v13, %v473_v31  ;;  %v485_v34 = vmul.f32 %v481_v13, %v475_v32 }
 0x196   : > { %v488_v35 = vadd.f32 %v486_v19, %v483_v33  ;;  %v490_v36 = vadd.f32 %v486_v19, %v485_v34 }
 0x198   : > { %v492_v37 = vmul.f32 %v488_v35, %v1351_v0  ;;  %v494_v38 = vmul.f32 %v490_v36, %v1353_v1 }
 0x19a   : > { %496 = vst.msk [vmem:[%s336_s1 + $0x8] sm:$0xff] %vm349_vm0, %v492_v37 }
 0x19b   : > { %498 = vst.msk [vmem:[%s336_s1 + $0x18] sm:$0xff] %vm349_vm0, %v494_v38 }
 0x19c   : > { %s707_s18 = sshll.u32 %s1478_s11, 4  ;;  %s525_s14 = sshll.u32 %s336_s1, 4  ;;  %s526_s14 = int_to_ptr.vmem [resolvable:$true] %s525_s14 }
 0x19d   : > { %s1480_s13 = sld [smem:[#allocation37_spill]]  ;;  %s1057_s21 = smov 256  }
 0x19e   : > { %725 = sst [smem:[#allocation15]] (%p1241_p3), %s1057_s21  ;;  %s1058_s25 = smov 1536  }
 0x19f   : > { %726 = sst [smem:[#allocation15 + $0x1]] (%p1241_p3), %s1058_s25  ;;  %s1059_s27 = smov 2  }
 0x1a0   : > { %727 = sst [smem:[#allocation15 + $0x2]] (%p1241_p3), %s1059_s27  ;;  %s1060_s12 = smov 128  }
 0x1a1   : > { %728 = sst [smem:[#allocation15 + $0x3]] (%p1241_p3), %s1060_s12  ;;  %s1061_s2 = smov 8  }
 0x1a2   : > { %729 = sst [smem:[#allocation15 + $0x4]] (%p1241_p3), %s1060_s12  ;;  %s1062_s7 = smov [#allocation14]  }
 0x1a3   : > { %s514_s29 = scalar_lea.hbm %s1480_s13, %s707_s18  ;;  %730 = sst [smem:[#allocation15 + $0x5]] (%p1241_p3), %s1061_s2 }
 0x1a4   : > { %s527_s20 = sshll.u32 %s514_s29, 4  ;;  %s1063_s19 = smov 0   ;;  %s528_s20 = int_to_ptr.hbm [resolvable:$true] %s527_s20 }
 0x1a5   : > { %731 = dma.general (%p1241_p3), %s526_s14, 512, %s528_s20, %s500_s8, %s1062_s7, [#allocation15], %s1063_s19, 0  }
 0x1a6 PF: > { %s1481_s22 = sld [smem:[#allocation26_spill]]  ;;  %p737_p1 = scmp.ge.s32.totalorder %s1044_s10, 2 }
 0x1a8   : > { %p734_p10 = pnand %p737_p1, %p1249_p7 }
 0x1aa   : > { %p735_p4 = pneg %p734_p10 }
 0x1ac   : > { %s555_s0 = sand.u32 1, %s1481_s22  }
 0x1ad   : > { %s556_s16 = scalar_lea.sflag [#allocation7], %s555_s0 }
 0x1ae   : > { %995 = dma.done.wait (%p735_p4), %s556_s16, 512  }
 0x1af   : > { %997 = vsyncadd (%p735_p4), %s556_s16, 4294966784  ;;  %s37_s10 = sadd.s32 1, %s1044_s10   ;;  %s1483_s11 = sld [smem:[#allocation24_spill]] }
 0x1b0   : > { %p34_p11 = scmp.ge.s32.totalorder %s37_s10, 8   ;;  %s1484_s1 = sld [smem:[#allocation35_spill]] }
 0x1b1   : > { %s1485_s17 = sld [smem:[#allocation25_spill]]  ;;  %s1491_s0 = smov %s1004_s26 }
 0x1b2   : > { %s1486_s29 = sld [smem:[#allocation32_spill]]  ;;  %s1493_s27 = smov %s1016_s28 }
 0x1b3   : > { %s1487_s24 = sld [smem:[#allocation27_spill]]  ;;  %s1495_s30 = smov %s1028_s6 }
 0x1b4   : > { %s1488_s7 = sld [smem:[#allocation31_spill]] }
 0x1b5   : > { %s1489_s8 = sld [smem:[#allocation29_spill]]  ;;  %s1492_s26 = smov %s1483_s11 }
 0x1b6   : > { %s1490_s9 = sld [smem:[#allocation30_spill]]  ;;  %36 = sbr.rel (!%p34_p11) target bundleno = 19 (0x13), region = 111 }
 0x1b7   : > { %s1494_s28 = smov %s1485_s17 }
 0x1b9   : > { %s1496_s6 = smov %s1487_s24 }
 0x1bb   :  { %562 = vsyncpa [#allocation6], 1 }
 0x1bc   :  { %564 = vsyncpa [#allocation6 + $0x1], 1 }
 0x1bd   :  { %565 = vsyncpa [#allocation9], 1 }
 0x1be   :  { %567 = vsyncpa [#allocation9 + $0x1], 1 }
 0x1bf   :  { %568 = vsyncpa [#allocation7], 1 }
 0x1c0   :  { %570 = vsyncpa [#allocation7 + $0x1], 1 }

</bundles_post_ra>
